<compile_context>
chip_gen: v7x
topology: tpu7x:2x2x1
jax: 0.10.0
libtpu: 0.0.40
codegen_flags: <defaults>
</compile_context>

<pallas_src>
import jax
import jax.numpy as jnp
from jax.experimental import pallas as pl
from jax.experimental.pallas import tpu as pltpu

LANE = 128


def _fused_conv1x1_sub_neg_kernel(x_ref, params_ref, o_ref):
    # x_ref / o_ref: (1, C, R_TILE, L) tiles in VMEM (input dtype preserved).
    # params_ref:    (C + 1,) f32 in SMEM: [w_0 .. w_{C-1}, bias + 0.2].
    C = x_ref.shape[1]

    # Hoist SMEM scalars once.
    w = [params_ref[k] for k in range(C)]
    b_eff = params_ref[C]

    # Load each channel once; compute in f32 (v5e has no bf16 VALU).
    xs = [x_ref[0, k].astype(jnp.float32) for k in range(C)]

    # 1x1 conv over channels == C VPU scaled-adds.
    conv_b = w[0] * xs[0] + b_eff
    for k in range(1, C):
        conv_b = conv_b + w[k] * xs[k]

    # v4 = (x - 0.2) - (conv + bias) = x - conv - (bias + 0.2)
    for c in range(C):
        o_ref[0, c] = (xs[c] - conv_b).astype(o_ref.dtype)


def _round_up(a, b):
    return (a + b - 1) // b * b


def _choose_row_tile(rows, unit, max_rows, batch_steps):
    """Sublane-row tile: (8/16,128)-legal, big enough to amortize per-step
    overhead, and leaving >= 2 spatial steps when the batch axis has one."""
    if rows <= unit:
        return rows  # full-extent block (legal even if not a multiple of unit)
    tile = min(_round_up(max_rows, unit), _round_up(rows, unit))
    if batch_steps == 1:
        # Keep >= 2 grid steps on the spatial axis so both v7x TCs get work.
        tile = min(tile, _round_up(pl.cdiv(rows, 2), unit))
    return max(tile, unit)


def model_forward(x_nchw, weight, bias, *, max_block_rows=512):
    """x_nchw: (N, C, H, W); weight: (1, C, 1, 1); bias: (1,)."""
    N, C, H, W = x_nchw.shape
    HW = H * W
    dtype = x_nchw.dtype
    itemsize = jnp.dtype(dtype).itemsize
    unit = 16 if itemsize < 4 else 8  # sublane packing unit (bf16 vs f32)

    # Lane-dense view without any extra HBM passes.
    if HW % LANE == 0:
        rows, lanes = HW // LANE, LANE        # free contiguous reshape
    else:
        rows, lanes = H, W                    # lane dim = W (full extent)
    x_view = x_nchw.reshape(N, C, rows, lanes)

    # Cap the block by a byte budget so wide-W shapes don't blow up VMEM.
    block_byte_budget = 3 * 1024 * 1024
    budget_rows = max(unit,
                      block_byte_budget // (C * _round_up(lanes, LANE) * itemsize))
    r_tile = _choose_row_tile(rows, unit, min(max_block_rows, budget_rows), N)
    grid = (N, pl.cdiv(rows, r_tile))

    # Fold bias and the 0.2 constant: out = x - w.x_channels - (bias + 0.2).
    params = jnp.concatenate(
        [weight.reshape(C).astype(jnp.float32),
         bias.reshape(1).astype(jnp.float32) + jnp.float32(0.2)])

    out = pl.pallas_call(
        _fused_conv1x1_sub_neg_kernel,
        out_shape=jax.ShapeDtypeStruct((N, C, rows, lanes), dtype),
        grid_spec=pltpu.PrefetchScalarGridSpec(
            num_scalar_prefetch=0,
            grid=grid,
            in_specs=[
                pl.BlockSpec((1, C, r_tile, lanes), lambda n, s: (n, 0, s, 0)),
                pl.BlockSpec(memory_space=pltpu.SMEM),   # [w..., bias + 0.2]
            ],
            out_specs=pl.BlockSpec((1, C, r_tile, lanes),
                                   lambda n, s: (n, 0, s, 0)),
        ),
        compiler_params=pltpu.CompilerParams(
            dimension_semantics=("parallel", "parallel"),
        ),
    )(x_view, params)

    return out.reshape(N, C, H, W)


def _reference(x_nchw, weight, bias):
    # Pure-JAX reference of the aligned (center-crop) semantics, in f32.
    x = x_nchw.astype(jnp.float32)
    w = weight.reshape(1, weight.shape[1]).astype(jnp.float32)       # (1, C)
    conv = jnp.einsum("nchw,oc->nohw", x, w) + bias.astype(jnp.float32).reshape(1, 1, 1, 1)
    v2 = x - 0.2
    return -(conv - v2)


if __name__ == "__main__":
    key = jax.random.PRNGKey(0)
    kx, kw, kb, kx2, kx3 = jax.random.split(key, 5)

    # Deterministic Conv2d(3, 1, 1) parameter init (PyTorch-style uniform bound).
    C = 3
    fan_in = C * 1 * 1
    bound = 1.0 / (fan_in ** 0.5)
    weight = jax.random.uniform(kw, (1, C, 1, 1), jnp.float32, -bound, bound)
    bias = jax.random.uniform(kb, (1,), jnp.float32, -bound, bound)

    # Case 1: f32, 128-divisible spatial size -> fully lane-dense path.
    N, H, W = 2, 32, 32
    x = jax.random.normal(kx, (N, C, H, W), dtype=jnp.float32)
    out = jax.block_until_ready(model_forward(x, weight, bias))
    ref = _reference(x, weight, bias)
    assert out.shape == (N, C, H, W)
    assert jnp.allclose(out, ref, atol=1e-5, rtol=1e-5), "mismatch (case 1)"

    # Case 2: the original module's spatial size (1, 3, 57, 57) -> ragged path
    # (no wrapper pad/slice; Pallas masks the partial lane/sublane tiles).
    x2 = jax.random.normal(kx2, (1, C, 57, 57), dtype=jnp.float32)
    out2 = jax.block_until_ready(model_forward(x2, weight, bias))
    ref2 = _reference(x2, weight, bias)
    assert out2.shape == (1, C, 57, 57)
    assert jnp.allclose(out2, ref2, atol=1e-5, rtol=1e-5), "mismatch (case 2)"

    # Case 3: bf16 I/O stays bf16 end-to-end (no wrapper cast pass).
    x3 = jax.random.normal(kx3, (2, C, 32, 64), dtype=jnp.bfloat16)
    out3 = jax.block_until_ready(model_forward(x3, weight, bias))
    ref3 = _reference(x3, weight, bias)
    assert out3.shape == (2, C, 32, 64) and out3.dtype == jnp.bfloat16
    assert jnp.allclose(out3.astype(jnp.float32), ref3, atol=5e-2, rtol=5e-2), \
        "mismatch (case 3)"

    print("KERNEL_OK")
</pallas_src>

<mosaic_0001>
module attributes {stable_mosaic.version = 11 : i64} {
  func.func @_fused_conv1x1_sub_neg_kernel(%arg0: i32, %arg1: i32, %arg2: memref<1x3x8x128xf32, #tpu.memory_space<vmem>>, %arg3: memref<4xf32, #tpu.memory_space<smem>>, %arg4: memref<1x3x8x128xf32, #tpu.memory_space<vmem>>) attributes {dimension_semantics = [#tpu.dimension_semantics<parallel>, #tpu.dimension_semantics<parallel>], iteration_bounds = array<i64: 2, 1>, scalar_prefetch = 0 : i64, scratch_operands = 0 : i64, tpu.core_type = #tpu.core_type<tc>, window_params = [{transform_indices = @transform_0, window_bounds = array<i64: 1, 3, 8, 128>}, {transform_indices = @transform_1, window_bounds = array<i64: 4>}, {transform_indices = @transform_2, window_bounds = array<i64: 1, 3, 8, 128>}]} {
    %c0 = arith.constant 0 : index
    %0 = memref.load %arg3[%c0] : memref<4xf32, #tpu.memory_space<smem>>
    %c1 = arith.constant 1 : index
    %1 = memref.load %arg3[%c1] : memref<4xf32, #tpu.memory_space<smem>>
    %c2 = arith.constant 2 : index
    %2 = memref.load %arg3[%c2] : memref<4xf32, #tpu.memory_space<smem>>
    %c3 = arith.constant 3 : index
    %3 = memref.load %arg3[%c3] : memref<4xf32, #tpu.memory_space<smem>>
    %c0_0 = arith.constant 0 : index
    %c0_1 = arith.constant 0 : index
    %c0_2 = arith.constant 0 : index
    %c0_3 = arith.constant 0 : index
    %4 = vector.load %arg2[%c0_0, %c0_1, %c0_2, %c0_3] : memref<1x3x8x128xf32, #tpu.memory_space<vmem>>, vector<1x1x8x128xf32>
    %5 = vector.shape_cast %4 : vector<1x1x8x128xf32> to vector<8x128xf32>
    %c0_4 = arith.constant 0 : index
    %c1_5 = arith.constant 1 : index
    %c0_6 = arith.constant 0 : index
    %c0_7 = arith.constant 0 : index
    %6 = vector.load %arg2[%c0_4, %c1_5, %c0_6, %c0_7] : memref<1x3x8x128xf32, #tpu.memory_space<vmem>>, vector<1x1x8x128xf32>
    %7 = vector.shape_cast %6 : vector<1x1x8x128xf32> to vector<8x128xf32>
    %c0_8 = arith.constant 0 : index
    %c2_9 = arith.constant 2 : index
    %c0_10 = arith.constant 0 : index
    %c0_11 = arith.constant 0 : index
    %8 = vector.load %arg2[%c0_8, %c2_9, %c0_10, %c0_11] : memref<1x3x8x128xf32, #tpu.memory_space<vmem>>, vector<1x1x8x128xf32>
    %9 = vector.shape_cast %8 : vector<1x1x8x128xf32> to vector<8x128xf32>
    %10 = vector.broadcast %0 : f32 to vector<8x128xf32>
    %11 = arith.mulf %10, %5 : vector<8x128xf32>
    %12 = vector.broadcast %3 : f32 to vector<8x128xf32>
    %13 = arith.addf %11, %12 : vector<8x128xf32>
    %14 = vector.broadcast %1 : f32 to vector<8x128xf32>
    %15 = arith.mulf %14, %7 : vector<8x128xf32>
    %16 = arith.addf %13, %15 : vector<8x128xf32>
    %17 = vector.broadcast %2 : f32 to vector<8x128xf32>
    %18 = arith.mulf %17, %9 : vector<8x128xf32>
    %19 = arith.addf %16, %18 : vector<8x128xf32>
    %20 = arith.subf %5, %19 : vector<8x128xf32>
    %c0_12 = arith.constant 0 : index
    %c0_13 = arith.constant 0 : index
    %c0_14 = arith.constant 0 : index
    %c0_15 = arith.constant 0 : index
    %21 = vector.load %arg4[%c0_12, %c0_13, %c0_14, %c0_15] : memref<1x3x8x128xf32, #tpu.memory_space<vmem>>, vector<1x1x8x128xf32>
    %22 = vector.shape_cast %21 : vector<1x1x8x128xf32> to vector<8x128xf32>
    %23 = vector.shape_cast %20 : vector<8x128xf32> to vector<1x1x8x128xf32>
    tpu.vector_store %arg4[%c0_12, %c0_13, %c0_14, %c0_15], %23 {strides = array<i32>} : memref<1x3x8x128xf32, #tpu.memory_space<vmem>>, vector<1x1x8x128xf32>,
    %24 = arith.subf %7, %19 : vector<8x128xf32>
    %c0_16 = arith.constant 0 : index
    %c1_17 = arith.constant 1 : index
    %c0_18 = arith.constant 0 : index
    %c0_19 = arith.constant 0 : index
    %25 = vector.load %arg4[%c0_16, %c1_17, %c0_18, %c0_19] : memref<1x3x8x128xf32, #tpu.memory_space<vmem>>, vector<1x1x8x128xf32>
    %26 = vector.shape_cast %25 : vector<1x1x8x128xf32> to vector<8x128xf32>
    %27 = vector.shape_cast %24 : vector<8x128xf32> to vector<1x1x8x128xf32>
    tpu.vector_store %arg4[%c0_16, %c1_17, %c0_18, %c0_19], %27 {strides = array<i32>} : memref<1x3x8x128xf32, #tpu.memory_space<vmem>>, vector<1x1x8x128xf32>,
    %28 = arith.subf %9, %19 : vector<8x128xf32>
    %c0_20 = arith.constant 0 : index
    %c2_21 = arith.constant 2 : index
    %c0_22 = arith.constant 0 : index
    %c0_23 = arith.constant 0 : index
    %29 = vector.load %arg4[%c0_20, %c2_21, %c0_22, %c0_23] : memref<1x3x8x128xf32, #tpu.memory_space<vmem>>, vector<1x1x8x128xf32>
    %30 = vector.shape_cast %29 : vector<1x1x8x128xf32> to vector<8x128xf32>
    %31 = vector.shape_cast %28 : vector<8x128xf32> to vector<1x1x8x128xf32>
    tpu.vector_store %arg4[%c0_20, %c2_21, %c0_22, %c0_23], %31 {strides = array<i32>} : memref<1x3x8x128xf32, #tpu.memory_space<vmem>>, vector<1x1x8x128xf32>,
    return
  }
  func.func @transform_0(%arg0: i32, %arg1: i32) -> (i32, i32, i32, i32) {
    %c0_i32 = arith.constant 0 : i32
    %c0_i32_0 = arith.constant 0 : i32
    %c0_i32_1 = arith.constant 0 : i32
    return %arg0, %c0_i32, %arg1, %c0_i32_0 : i32, i32, i32, i32
  }
  func.func @transform_1(%arg0: i32, %arg1: i32) -> i32 {
    %c0_i32 = arith.constant 0 : i32
    %c0_i32_0 = arith.constant 0 : i32
    return %c0_i32 : i32
  }
  func.func @transform_2(%arg0: i32, %arg1: i32) -> (i32, i32, i32, i32) {
    %c0_i32 = arith.constant 0 : i32
    %c0_i32_0 = arith.constant 0 : i32
    %c0_i32_1 = arith.constant 0 : i32
    return %arg0, %c0_i32, %arg1, %c0_i32_0 : i32, i32, i32, i32
  }
}

</mosaic_0001>

<bundles_post_ra>
// kernel: tpu_custom_call.1
= control target key start
LH: loop header
LB: loop body
LE: loop exit
PB: predicated region body
PF: predicated region fallthrough
CT: control target
= control target key end

     0   :  { %7 = vsyncpa [#allocation3], 0  ;;  %s798_s0 = inlined_call_operand.hbm [shape: f32[2,3,8,128], index: 0, kind: input, shape index: {}]   ;;  %s799_s1 = inlined_call_operand.vmem [shape: f32[4], index: 1, kind: input, shape index: {}]   ;;  %s800_s2 = inlined_call_operand.hbm [shape: f32[2,3,8,128], index: 2, kind: output, shape index: {}]  }
   0x1   :  { %9 = vsyncpa [#allocation3 + $0x1], 0 }
   0x2   :  { %10 = vsyncpa [#allocation5], 0 }
   0x3   :  { %11 = vsyncpa [#allocation4], 0 }
   0x4   :  { %13 = vsyncpa [#allocation4 + $0x1], 0  ;;  %s586_s9 = smov 0   ;;  %s588_s10 = smov 0  }
   0x5   :  { %s590_s11 = smov 0   ;;  %s592_s12 = smov 0  }
   0x6   :  { %s594_s13 = smov 0   ;;  %s596_s14 = smov 0  }
   0x7 LB: > { %s332_s15 = sadd.s32 4294967295, %s562_s14   ;;  %s333_s16 = sadd.s32 4294967294, %s562_s14   ;;  %s562_s14 = sphi %s596_s14, %s19_s14   ;;  %s558_s13 = sphi %s594_s13, %s823_s13   ;;  %s554_s12 = sphi %s592_s12, %s822_s12   ;;  %s550_s11 = sphi %s590_s11, %s821_s11   ;;  %s546_s10 = sphi %s588_s10, %s820_s10   ;;  %s542_s9 = sphi %s586_s9, %s819_s9  }
   0x8   : > { %s40_s17 = sadd.s32 1, %s550_s11  ;;  %p47_p0 = scmp.ne.s32.totalorder %s550_s11, %s546_s10 }
   0x9   : > { %p48_p1 = scmp.eq.s32.totalorder %s562_s14, 0  ;;  %p53_p2 = scmp.ne.s32.totalorder %s546_s10, %s542_s9 }
   0xa   : > { %p624_p3 = scmp.eq.s32.totalorder %s332_s15, 0  ;;  %p100_p4 = scmp.eq.s32.totalorder %s332_s15, 1 }
   0xb   : > { %p628_p5 = por %p48_p1, %p47_p0  ;;  %p106_p6 = scmp.eq.s32.totalorder %s333_s16, 1 }
   0xc   : > { %s805_s18 = scalar_select %p624_p3, 1, 0 }
   0xd   : > { %p634_p7 = por %p624_p3, %p53_p2  ;;  %p638_p8 = por %p100_p4, %p47_p0 }
   0xe   : > { %p642_p9 = por %p106_p6, %p53_p2  ;;  %p334_p10 = scmp.ge.s32.totalorder %s562_s14, 1 }
   0xf   : > { %s807_s20 = scalar_select %p634_p7, 1, 0 }
  0x10   : > { %s808_s21 = scalar_select %p638_p8, 1, 0 }
  0x11   : > { %s809_s22 = scalar_select %p642_p9, 1, 0 }
  0x12   : > { %p113_p11 = scmp.lt.s32.totalorder %s562_s14, 3  ;;  %s126_s25 = sshll.u32 %s799_s1, 4  ;;  %s127_s25 = int_to_ptr.vmem [resolvable:$true] %s126_s25 }
  0x13   : > { %p375_p0 = scmp.lt.s32.totalorder %s562_s14, 2  ;;  %s31_s29 = sadd.s32 1, %s558_s13 }
  0x14   : > { %p651_p12 = pnand %p334_p10, %p113_p11  ;;  %p672_p6 = scmp.ge.s32.totalorder %s31_s29, 2 }
  0x15   : > { %p661_p2 = pnand %p375_p0, %p628_p5  ;;  %s137_s3 = sand.u32 1, %s550_s11  }
  0x16   : > { %p362_p1 = pneg %p651_p12  ;;  %s431_s4 = scalar_lea.vmem %s127_s25, 16 }
  0x17   : > { %p432_p10 = scmp.ne.s32.totalorder %s127_s25, %s431_s4  ;;  %p439_p13 = scmp.lt.s32.totalorder %s127_s25, %s127_s25 }
  0x18   : > { %p667_p4 = pnand %p362_p1, %p624_p3  ;;  %p440_p9 = scmp.lt.s32.totalorder %s431_s4, %s431_s4 }
  0x1a   : > { %p433_p11 = pneg %p667_p4  ;;  %p441_p8 = por %p440_p9, %p439_p13 }
  0x1c   : > { %p434_p5 = pnand %p433_p11, %p432_p10 }
  0x1e   : > { %p435_p0 = pneg %p434_p5 }
  0x20   : > { %p442_p1 = pnand %p441_p8, %p435_p0 }
  0x22   : > { %445 = shalt.err (!%p442_p1)
}
  0x23   : > { %s564_s5 = smov [#allocation6]   ;;  %s825_s29 = smov (%p672_p6, %s31_s29), 0 }
  0x24   : > { %365 = dma.vmem_to_smem (!%p667_p4), %s127_s25, 16, %s564_s5, [#allocation5]  }
  0x25   : > { %s350_s6 = smul.u32 24, %s137_s3  ;;  %s35_s7 = ssub.s32 %s558_s13, %s825_s29 }
  0x26   : > { %s351_s8 = smul.u32 384, %s558_s13  ;;  %p38_p8 = scmp.eq.s32.totalorder %s35_s7, 0 }
  0x27   : > { %s141_s23 = scalar_lea.vmem [#allocation2], %s350_s6  ;;  %s700_s28 = scalar_lea.sflag [#allocation3], %s137_s3 }
  0x28   : > { %s691_s19 = scalar_lea.hbm %s798_s0, %s351_s8  ;;  %s149_s24 = sshll.u32 %s141_s23, 4  ;;  %s698_s24 = int_to_ptr.vmem [resolvable:$true] %s149_s24 }
  0x29   : > { %s696_s25 = scalar_select %p38_p8, %s550_s11, %s40_s17  }
  0x2a   : > { %s446_s30 = scalar_lea.hbm %s691_s19, 384  ;;  %p448_p13 = pneg %p661_p2 }
  0x2b   : > { %p447_p9 = scmp.ne.s32.totalorder %s691_s19, %s446_s30  ;;  %s451_s6 = scalar_lea.hbm %s798_s0, 768 }
  0x2c   : > { %p452_p10 = scmp.lt.u32.totalorder %s691_s19, %s798_s0  ;;  %p453_p11 = scmp.lt.u32.totalorder %s451_s6, %s446_s30 }
  0x2d   : > { %p449_p4 = pnand %p448_p13, %p447_p9  ;;  %p455_p0 = scmp.lt.u32.totalorder %s446_s30, %s691_s19 }
  0x2e   : > { %p454_p5 = por %p453_p11, %p452_p10 }
  0x2f   : > { %p450_p6 = pneg %p449_p4 }
  0x30   : > { %p456_p1 = por %p455_p0, %p454_p5 }
  0x32   : > { %p457_p8 = pnand %p456_p1, %p450_p6 }
  0x34   : > { %460 = shalt.err (!%p457_p8)
}
  0x35   : > { %s461_s17 = scalar_lea.vmem %s698_s24, 384  ;;  %s565_s3 = smov [#allocation2]  }
  0x36   : > { %p462_p9 = scmp.ne.s32.totalorder %s698_s24, %s461_s17  ;;  %s466_s15 = sshll.u32 %s565_s3, 4  ;;  %s467_s15 = int_to_ptr.vmem [resolvable:$false] %s466_s15 }
  0x37   : > { %s468_s16 = scalar_lea.vmem %s467_s15, 768  ;;  %p469_p7 = scmp.lt.s32.totalorder %s698_s24, %s467_s15 }
  0x38   : > { %p464_p4 = pnand %p462_p9, %p448_p13  ;;  %p470_p10 = scmp.lt.s32.totalorder %s468_s16, %s461_s17 }
  0x3a   : > { %p465_p3 = pneg %p464_p4  ;;  %p471_p11 = por %p470_p10, %p469_p7 }
  0x3c   : > { %p472_p5 = pnand %p471_p11, %p465_p3 }
  0x3e   : > { %475 = shalt.err (!%p472_p5)
}
  0x3f   : > { %s566_s23 = smov 128   ;;  %s567_s30 = smov 8  }
  0x40   : > { %369 = dma.hbm_to_vmem [thread:$0]  (!%p661_p2), %s691_s19, 384, %s698_s24, %s700_s28, %s566_s23, %s566_s23, %s567_s30  }
  0x41   : > { %161 = sbr.rel (%p651_p12) target bundleno = 111 (0x6f), region = 28  ;;  %s731_s4 = sand.u32 (!%p651_p12), 1, %s546_s10  }
  0x42   : > { %s352_s5 = smul.u32 (!%p651_p12), 24, %s731_s4  ;;  %s164_s6 = scalar_lea.sflag (!%p651_p12), [#allocation3], %s731_s4 }
  0x43   : > { %p814_p3 = scmp.ne.s32.totalorder (!%p651_p12), %s807_s20, 0 }
  0x44   : > { %s167_s7 = scalar_lea.vmem (!%p651_p12), [#allocation2], %s352_s5 }
  0x48   : > { %529 = dma.done.wait (%p814_p3), %s164_s6, 384  }
  0x49   : > { %531 = vsyncadd (%p814_p3), %s164_s6, 4294966912  ;;  %p815_p7 = scmp.ne.s32.totalorder %s805_s18, 0 }
  0x4b   : > { %533 = dma.done.wait (%p815_p7), [#allocation5], 16  }
  0x4c   : > { %535 = vsyncadd (%p815_p7), [#allocation5], 4294967280 }
  0x4d   : > { %176 = sfence }
  0x4e   : > { %s193_s26 = sld [smem:[#allocation6]]  ;;  %s340_s27 = sld [smem:[#allocation6 + $0x1]]  ;;  %v197_v0 = vld [vmem:[%s167_s7] sm:$0xff]  ;;  %v343_v1 = vld [vmem:[%s167_s7 + $0x8] sm:$0xff]  ;;  %v344_v2 = vld [vmem:[%s167_s7 + $0x10] sm:$0xff] }
  0x4f   : > { %s341_s19 = sld [smem:[#allocation6 + $0x2]]  ;;  %s342_s24 = sld [smem:[#allocation6 + $0x3]] }
  0x50   : > { %s192_s18 = scalar_lea.vmem [#allocation7], %s352_s5  ;;  %s353_s28 = smul.u32 384, %s554_s12 }
  0x51   : > { %s235_s20 = sshll.u32 %s192_s18, 4  ;;  %s221_s15 = scalar_lea.sflag [#allocation4], %s731_s4  ;;  %s744_s20 = int_to_ptr.vmem [resolvable:$true] %s235_s20 }
  0x52   : > { %s749_s3 = scalar_lea.hbm %s800_s2, %s353_s28  ;;  %s476_s16 = scalar_lea.vmem %s744_s20, 384 }
  0x53   : > { %p477_p12 = scmp.ne.s32.totalorder %s744_s20, %s476_s16  ;;  %p816_p2 = scmp.ne.s32.totalorder %s808_s21, 0 }
  0x54   : > { %v202_v3 = vstv %s193_s26  ;;  %v206_v5 = vstv %s340_s27  ;;  %s568_s12 = smov [#allocation7]  }
  0x55   : > { %v203_v4 = vmul.f32 %v202_v3, %v197_v0  ;;  %v209_v6 = vstv %s341_s19  ;;  %v204_v7 = vstv %s342_s24  ;;  %v207_v8 = vmul.f32 %v343_v1, %v206_v5  ;;  %p478_p13 = pnand %p477_p12, %p816_p2  ;;  %s480_s23 = sshll.u32 %s568_s12, 4  ;;  %s481_s23 = int_to_ptr.vmem [resolvable:$false] %s480_s23 }
  0x56   : > { %v210_v10 = vmul.f32 %v344_v2, %v209_v6  ;;  %s482_s30 = scalar_lea.vmem %s481_s23, 768  ;;  %p483_p0 = scmp.lt.s32.totalorder %s744_s20, %s481_s23 }
  0x57   : > { %v205_v9 = vadd.f32 %v204_v7, %v203_v4  ;;  %p479_p6 = pneg %p478_p13  ;;  %p484_p1 = scmp.lt.s32.totalorder %s482_s30, %s476_s16 }
  0x59   : > { %v208_v11 = vadd.f32 %v207_v8, %v205_v9  ;;  %p485_p8 = por %p484_p1, %p483_p0 }
  0x5b   : > { %v211_v12 = vadd.f32 %v210_v10, %v208_v11  ;;  %p486_p9 = pnand %p485_p8, %p479_p6 }
  0x5d   : > { %v212_v13 = vsub.f32 %v197_v0, %v211_v12  ;;  %v214_v14 = vsub.f32 %v343_v1, %v211_v12  ;;  %v217_v15 = vsub.f32 %v344_v2, %v211_v12 }
  0x5f   : > { %213 = vst [vmem:[%s192_s18] sm:$0xff] %v212_v13  ;;  %345 = vst [vmem:[%s192_s18 + $0x8] sm:$0xff] %v214_v14 }
  0x60   : > { %346 = vst [vmem:[%s192_s18 + $0x10] sm:$0xff] %v217_v15 }
  0x61   : > { %489 = shalt.err (!%p486_p9)
}
  0x62   : > { %s490_s5 = scalar_lea.hbm %s749_s3, 384  ;;  %s494_s26 = scalar_lea.hbm %s800_s2, 768 }
  0x63   : > { %p491_p4 = scmp.ne.s32.totalorder %s749_s3, %s490_s5  ;;  %p495_p5 = scmp.lt.u32.totalorder %s749_s3, %s800_s2 }
  0x64   : > { %p496_p3 = scmp.lt.u32.totalorder %s494_s26, %s490_s5  ;;  %p498_p12 = scmp.lt.u32.totalorder %s490_s5, %s749_s3 }
  0x65   : > { %p492_p10 = pnand %p491_p4, %p816_p2 }
  0x66   : > { %p497_p7 = por %p496_p3, %p495_p5 }
  0x67   : > { %p493_p11 = pneg %p492_p10 }
  0x68   : > { %p499_p13 = por %p498_p12, %p497_p7 }
  0x6a   : > { %p500_p6 = pnand %p499_p13, %p493_p11 }
  0x6c   : > { %503 = shalt.err (!%p500_p6)
}
  0x6d   : > { %s569_s24 = smov 128   ;;  %s570_s18 = smov 8  }
  0x6e   : > { %360 = dma.vmem_to_hbm [thread:$0]  (%p816_p2), %s744_s20, 384, %s749_s3, %s221_s15, %s569_s24, %s569_s24, %s570_s18  }
  0x6f PF: > { %s250_s28 = sand.u32 1, %s542_s9   ;;  %p817_p0 = scmp.ne.s32.totalorder %s809_s22, 0 }
  0x70   : > { %p818_p1 = scmp.ge.s32.totalorder %s562_s14, 2  ;;  %s251_s8 = scalar_lea.sflag [#allocation4], %s250_s28 }
  0x72   : > { %p371_p8 = pnand %p818_p1, %p817_p0 }
  0x74   : > { %537 = dma.done.wait (!%p371_p8), %s251_s8, 384  }
  0x75   : > { %539 = vsyncadd (!%p371_p8), %s251_s8, 4294966912  ;;  %s19_s14 = sadd.s32 1, %s562_s14   ;;  %s819_s9 = smov %s546_s10 }
  0x76   : > { %p16_p9 = scmp.ge.s32.totalorder %s19_s14, 4   ;;  %s820_s10 = smov %s550_s11 }
  0x77   : > { %s821_s11 = smov %s696_s25  ;;  %s822_s12 = smov %s558_s13 }
  0x78   : > { %s823_s13 = smov %s825_s29  ;;  %18 = sbr.rel (!%p16_p9) target bundleno = 7 (0x7), region = 82 }
  0x7f   :  { %256 = vsyncpa [#allocation3], 1 }
  0x80   :  { %258 = vsyncpa [#allocation3 + $0x1], 1 }
  0x81   :  { %259 = vsyncpa [#allocation4], 1 }
  0x82   :  { %261 = vsyncpa [#allocation4 + $0x1], 1 }
  0x83   :  { %262 = vsyncpa [#allocation5], 1 }
  0x84   :  { %264 = vsyncpa [#allocation5 + $0x1], 1 }

</bundles_post_ra>
